<compile_context>
chip_gen: v6e
topology: v6e:2x2x1
jax: 0.10.0
libtpu: 0.0.40
codegen_flags: <defaults>
</compile_context>

<pallas_src>
from functools import partial

import jax
import jax.numpy as jnp
from jax import lax
from jax.experimental import pallas as pl
from jax.experimental.pallas import tpu as pltpu


def _round_up(x, m):
    return ((x + m - 1) // m) * m


def _pose_predictor_kernel(x_ref, w_ref, b_ref, o_ref, *, x_compute_dtype,
                           approx_sigmoid):
    x = x_ref[...]
    if x_compute_dtype is not None and x.dtype != jnp.dtype(x_compute_dtype):
        x = x.astype(x_compute_dtype)            # VPU cast, no extra HBM pass
    # (TM, C) x (C, K) -> (TM, K) on the MXU, f32 accumulation.  The weight is
    # already stored (C, K) so no per-step relayout/transpose is needed.
    logits = lax.dot_general(
        x, w_ref[...],
        dimension_numbers=(((1,), (0,)), ((), ())),
        preferred_element_type=jnp.float32)
    logits = logits + b_ref[...]                 # (TM, K) + (1, K) broadcast
    if approx_sigmoid:
        z = jnp.exp(-logits)                                 # EUP exp
        sig = pl.reciprocal(1.0 + z, approx=True)            # EUP vrcp
    else:
        sig = jax.nn.sigmoid(logits)
    o_ref[...] = sig.astype(o_ref.dtype)


def fpn_pose_predictor(x, weight, bias, *, compute_dtype=None, max_tm=2048,
                       approx_sigmoid=True):
    """Forward pass of FPNPredictor.

    x:      (N, C) or (N, C, 1, 1)
    weight: (num_classes, C)   (PyTorch nn.Linear layout, NOT transposed)
    bias:   (num_classes,)
    returns (N, num_classes) in x's dtype
    """
    if x.ndim == 4:
        assert x.shape[2] == 1 and x.shape[3] == 1, "expected (N, C, 1, 1)"
        x = x.reshape(x.shape[0], -1)

    n, c = x.shape
    k = weight.shape[0]
    out_dtype = x.dtype

    if n == 0:
        return jnp.zeros((0, k), out_dtype)

    # One-time weight transpose to (C, K).
    # TODO(synk): in a real deployment store the weight pre-transposed so even
    # this one-time XLA transpose disappears.
    w_t = weight.T
    if compute_dtype is not None:
        w_t = w_t.astype(compute_dtype)          # small & VMEM-resident: cheap
    b2d = bias.reshape(1, k).astype(jnp.float32)

    eff_x_dtype = jnp.dtype(compute_dtype) if compute_dtype is not None else jnp.dtype(x.dtype)
    row_mult = {1: 32, 2: 16}.get(eff_x_dtype.itemsize, 8)

    # --- per-generation VMEM budget ------------------------------------------
    try:
        vmem_cap = int(pltpu.get_tpu_info().vmem_capacity_bytes)
    except Exception:
        vmem_cap = 64 << 20                      # conservative (v7x per-TC size)
    # ~60% of physical VMEM, never above 48 MiB: safe on v7x (64 MiB/TC),
    # generous on v5e/v6e (128 MiB) where big tiles reach ~85% of HBM roofline.
    vmem_budget = max(16 << 20, min(48 << 20, (vmem_cap * 3) // 5))

    # --- TM sizing (VMEM footprints include lane/sublane padding) ------------
    x_bytes = jnp.dtype(x.dtype).itemsize
    w_bytes = jnp.dtype(w_t.dtype).itemsize
    c_lanes = _round_up(c, 128)
    k_lanes = _round_up(k, 128)
    # Resident weight + bias, single-buffered (pl.Buffered(1)).
    resident = _round_up(c, 8) * k_lanes * w_bytes + 8 * k_lanes * 4
    # Streamed x tile + out tile, double-buffered.
    per_row = (c_lanes * x_bytes + k_lanes * 4) * 2
    slack = 2 << 20
    tm = (vmem_budget - resident - slack) // per_row
    tm = max(row_mult, (tm // row_mult) * row_mult)
    tm = min(tm, max_tm)

    # Keep >=2 (ideally >=4) grid steps when N is large enough so v7x's second
    # TensorCore gets work and prefetch overlaps compute.
    if n >= 4 * row_mult:
        target_steps = 4
    elif n >= 2 * row_mult:
        target_steps = 2
    else:
        target_steps = 1
    tm = min(tm, _round_up(-(-n // target_steps), row_mult))
    tm = max(tm, row_mult)

    n_pad = _round_up(n, tm)
    x_p = jnp.pad(x, ((0, n_pad - n), (0, 0))) if n_pad != n else x

    grid = (n_pad // tm,)
    cost = pl.CostEstimate(
        flops=2 * n_pad * c * k,
        transcendentals=n_pad * k,
        bytes_accessed=(n_pad * c * x_bytes      # x
                        + c * k * w_bytes + k * 4  # weight + bias
                        + n_pad * k * 4))        # output

    kernel = partial(_pose_predictor_kernel,
                     x_compute_dtype=compute_dtype,
                     approx_sigmoid=approx_sigmoid)

    def build_call(single_buffer_resident):
        resident_kw = ({"pipeline_mode": pl.Buffered(1)}
                       if single_buffer_resident else {})
        return pl.pallas_call(
            kernel,
            out_shape=jax.ShapeDtypeStruct((n_pad, k), out_dtype),
            grid_spec=pl.GridSpec(
                grid=grid,
                in_specs=[
                    pl.BlockSpec((tm, c), lambda i: (i, 0)),               # streamed activations
                    pl.BlockSpec((c, k), lambda i: (0, 0), **resident_kw),  # resident weight (C, K)
                    pl.BlockSpec((1, k), lambda i: (0, 0), **resident_kw),  # resident bias
                ],
                out_specs=pl.BlockSpec((tm, k), lambda i: (i, 0)),
            ),
            compiler_params=pltpu.CompilerParams(
                dimension_semantics=("parallel",),
                vmem_limit_bytes=int(vmem_budget)),
            cost_estimate=cost,
        )

    # TODO(synk): very large C*K (resident weight exceeding the VMEM budget)
    # would need a K or C grid axis with an accumulator; not needed for
    # pose-head representation sizes.
    try:
        out = jax.block_until_ready(build_call(True)(x_p, w_t, b2d))
    except Exception:
        # Fallback for runtimes without Buffered(1) single-buffering support:
        # default double-buffering of the (tiny) resident blocks.
        out = build_call(False)(x_p, w_t, b2d)

    return out if n_pad == n else out[:n]


if __name__ == "__main__":
    # Small shapes consistent with the module:
    #   representation_size (in_channels) = 32, num_classes = 8, batch = 4
    batch, in_channels, num_classes = 4, 32, 8

    key = jax.random.PRNGKey(0)
    kx, kw = jax.random.split(key)

    # Deterministic synthetic parameters matching nn.init in __init__:
    #   weight ~ N(0, 0.01), bias = 0
    weight = 0.01 * jax.random.normal(kw, (num_classes, in_channels), jnp.float32)
    bias = jnp.zeros((num_classes,), jnp.float32)

    # Input in the 4-D NCHW form the module accepts (H=W=1).
    x = jax.random.normal(kx, (batch, in_channels, 1, 1), jnp.float32)

    out = fpn_pose_predictor(x, weight, bias)
    out = jax.block_until_ready(out)

    # Reference check in plain JAX (tolerance leaves headroom for the EUP
    # approximate-reciprocal sigmoid path).
    ref = jax.nn.sigmoid(x.reshape(batch, in_channels) @ weight.T + bias)
    assert out.shape == (batch, num_classes)
    assert jnp.allclose(out, ref, atol=5e-3, rtol=5e-3), \
        float(jnp.max(jnp.abs(out - ref)))

    print("KERNEL_OK")
</pallas_src>

<mosaic_0001>
module attributes {stable_mosaic.version = 11 : i64} {
  func.func @_pose_predictor_kernel(%arg0: i32, %arg1: memref<8x32xf32, #tpu.memory_space<vmem>>, %arg2: memref<32x8xf32, #tpu.memory_space<vmem>>, %arg3: memref<1x8xf32, #tpu.memory_space<vmem>>, %arg4: memref<8x8xf32, #tpu.memory_space<vmem>>) attributes {dimension_semantics = [#tpu.dimension_semantics<parallel>], iteration_bounds = array<i64: 1>, scalar_prefetch = 0 : i64, scratch_operands = 0 : i64, tpu.core_type = #tpu.core_type<tc>, window_params = [{transform_indices = @transform_0, window_bounds = array<i64: 8, 32>}, {pipeline_mode = #tpu.pipeline_mode<synchronous>, transform_indices = @transform_1, window_bounds = array<i64: 32, 8>}, {pipeline_mode = #tpu.pipeline_mode<synchronous>, transform_indices = @transform_2, window_bounds = array<i64: 1, 8>}, {transform_indices = @transform_3, window_bounds = array<i64: 8, 8>}]} {
    %c0 = arith.constant 0 : index
    %c0_0 = arith.constant 0 : index
    %0 = vector.load %arg1[%c0, %c0_0] : memref<8x32xf32, #tpu.memory_space<vmem>>, vector<8x32xf32>
    %c0_1 = arith.constant 0 : index
    %c0_2 = arith.constant 0 : index
    %1 = vector.load %arg2[%c0_1, %c0_2] : memref<32x8xf32, #tpu.memory_space<vmem>>, vector<32x8xf32>
    %cst = arith.constant dense<0.000000e+00> : vector<8x8xf32>
    %2 = tpu.matmul %0, %1, %cst {dimension_numbers = #tpu.dot_dimension_numbers<[1], [0], [0], [1], [0, 0, 1, 1], [], []>} : vector<8x32xf32>, vector<32x8xf32>, vector<8x8xf32> -> vector<8x8xf32>
    %c0_3 = arith.constant 0 : index
    %c0_4 = arith.constant 0 : index
    %3 = vector.load %arg3[%c0_3, %c0_4] : memref<1x8xf32, #tpu.memory_space<vmem>>, vector<1x8xf32>
    %4 = vector.broadcast %3 : vector<1x8xf32> to vector<8x8xf32>
    %5 = arith.addf %2, %4 : vector<8x8xf32>
    %cst_5 = arith.constant 0.000000e+00 : f32
    %6 = vector.broadcast %cst_5 : f32 to vector<8x8xf32>
    %7 = arith.subf %6, %5 : vector<8x8xf32>
    %8 = math.exp %7 : vector<8x8xf32>
    %cst_6 = arith.constant 1.000000e+00 : f32
    %9 = vector.broadcast %cst_6 : f32 to vector<8x8xf32>
    %10 = arith.addf %9, %8 : vector<8x8xf32>
    %11 = tpu.reciprocal %10 {approx = true} : vector<8x8xf32> -> vector<8x8xf32>
    %c0_7 = arith.constant 0 : index
    %c0_8 = arith.constant 0 : index
    %12 = vector.load %arg4[%c0_7, %c0_8] : memref<8x8xf32, #tpu.memory_space<vmem>>, vector<8x8xf32>
    tpu.vector_store %arg4[%c0_7, %c0_8], %11 {strides = array<i32>} : memref<8x8xf32, #tpu.memory_space<vmem>>, vector<8x8xf32>,
    return
  }
  func.func @transform_0(%arg0: i32) -> (i32, i32) {
    %c0_i32 = arith.constant 0 : i32
    %c0_i32_0 = arith.constant 0 : i32
    return %arg0, %c0_i32 : i32, i32
  }
  func.func @transform_1(%arg0: i32) -> (i32, i32) {
    %c0_i32 = arith.constant 0 : i32
    %c0_i32_0 = arith.constant 0 : i32
    %c0_i32_1 = arith.constant 0 : i32
    return %c0_i32, %c0_i32_0 : i32, i32
  }
  func.func @transform_2(%arg0: i32) -> (i32, i32) {
    %c0_i32 = arith.constant 0 : i32
    %c0_i32_0 = arith.constant 0 : i32
    %c0_i32_1 = arith.constant 0 : i32
    return %c0_i32, %c0_i32_0 : i32, i32
  }
  func.func @transform_3(%arg0: i32) -> (i32, i32) {
    %c0_i32 = arith.constant 0 : i32
    %c0_i32_0 = arith.constant 0 : i32
    return %arg0, %c0_i32 : i32, i32
  }
}

module attributes {stable_mosaic.version = 11 : i64} {
  func.func @_pose_predictor_kernel(%arg0: i32, %arg1: memref<8x32xf32, #tpu.memory_space<vmem>>, %arg2: memref<32x8xf32, #tpu.memory_space<vmem>>, %arg3: memref<1x8xf32, #tpu.memory_space<vmem>>, %arg4: memref<8x8xf32, #tpu.memory_space<vmem>>) attributes {dimension_semantics = [#tpu.dimension_semantics<parallel>], iteration_bounds = array<i64: 1>, scalar_prefetch = 0 : i64, scratch_operands = 0 : i64, tpu.core_type = #tpu.core_type<tc>, window_params = [{transform_indices = @transform_0, window_bounds = array<i64: 8, 32>}, {pipeline_mode = #tpu.pipeline_mode<synchronous>, transform_indices = @transform_1, window_bounds = array<i64: 32, 8>}, {pipeline_mode = #tpu.pipeline_mode<synchronous>, transform_indices = @transform_2, window_bounds = array<i64: 1, 8>}, {transform_indices = @transform_3, window_bounds = array<i64: 8, 8>}]} {
    %c0 = arith.constant 0 : index
    %c0_0 = arith.constant 0 : index
    %0 = vector.load %arg1[%c0, %c0_0] : memref<8x32xf32, #tpu.memory_space<vmem>>, vector<8x32xf32>
    %c0_1 = arith.constant 0 : index
    %c0_2 = arith.constant 0 : index
    %1 = vector.load %arg2[%c0_1, %c0_2] : memref<32x8xf32, #tpu.memory_space<vmem>>, vector<32x8xf32>
    %cst = arith.constant dense<0.000000e+00> : vector<8x8xf32>
    %2 = tpu.matmul %0, %1, %cst {dimension_numbers = #tpu.dot_dimension_numbers<[1], [0], [0], [1], [0, 0, 1, 1], [], []>} : vector<8x32xf32>, vector<32x8xf32>, vector<8x8xf32> -> vector<8x8xf32>
    %c0_3 = arith.constant 0 : index
    %c0_4 = arith.constant 0 : index
    %3 = vector.load %arg3[%c0_3, %c0_4] : memref<1x8xf32, #tpu.memory_space<vmem>>, vector<1x8xf32>
    %4 = vector.broadcast %3 : vector<1x8xf32> to vector<8x8xf32>
    %5 = arith.addf %2, %4 : vector<8x8xf32>
    %cst_5 = arith.constant 0.000000e+00 : f32
    %6 = vector.broadcast %cst_5 : f32 to vector<8x8xf32>
    %7 = arith.subf %6, %5 : vector<8x8xf32>
    %8 = math.exp %7 : vector<8x8xf32>
    %cst_6 = arith.constant 1.000000e+00 : f32
    %9 = vector.broadcast %cst_6 : f32 to vector<8x8xf32>
    %10 = arith.addf %9, %8 : vector<8x8xf32>
    %11 = tpu.reciprocal %10 {approx = true} : vector<8x8xf32> -> vector<8x8xf32>
    %c0_7 = arith.constant 0 : index
    %c0_8 = arith.constant 0 : index
    %12 = vector.load %arg4[%c0_7, %c0_8] : memref<8x8xf32, #tpu.memory_space<vmem>>, vector<8x8xf32>
    tpu.vector_store %arg4[%c0_7, %c0_8], %11 {strides = array<i32>} : memref<8x8xf32, #tpu.memory_space<vmem>>, vector<8x8xf32>,
    return
  }
  func.func @transform_0(%arg0: i32) -> (i32, i32) {
    %c0_i32 = arith.constant 0 : i32
    %c0_i32_0 = arith.constant 0 : i32
    return %arg0, %c0_i32 : i32, i32
  }
  func.func @transform_1(%arg0: i32) -> (i32, i32) {
    %c0_i32 = arith.constant 0 : i32
    %c0_i32_0 = arith.constant 0 : i32
    %c0_i32_1 = arith.constant 0 : i32
    return %c0_i32, %c0_i32_0 : i32, i32
  }
  func.func @transform_2(%arg0: i32) -> (i32, i32) {
    %c0_i32 = arith.constant 0 : i32
    %c0_i32_0 = arith.constant 0 : i32
    %c0_i32_1 = arith.constant 0 : i32
    return %c0_i32, %c0_i32_0 : i32, i32
  }
  func.func @transform_3(%arg0: i32) -> (i32, i32) {
    %c0_i32 = arith.constant 0 : i32
    %c0_i32_0 = arith.constant 0 : i32
    return %arg0, %c0_i32 : i32, i32
  }
}

</mosaic_0001>

<bundles_post_ra>
// kernel: tpu_custom_call.1
= control target key start
LH: loop header
LB: loop body
LE: loop exit
PB: predicated region body
PF: predicated region fallthrough
CT: control target
= control target key end

     0   :  { %v169_v1 = vmov 0.0   ;;  %vm170_vm0 = vmmov 0   ;;  %s213_s0 = inlined_call_operand.vmem [shape: f32[8,32], index: 0, kind: input, shape index: {}]   ;;  %s214_s1 = inlined_call_operand.vmem [shape: f32[32,8], index: 1, kind: input, shape index: {}]   ;;  %s215_s2 = inlined_call_operand.vmem [shape: f32[1,8], index: 2, kind: input, shape index: {}]   ;;  %s216_s3 = inlined_call_operand.hbm [shape: f32[8,8], index: 3, kind: output, shape index: {}]  }
   0x1   :  { %v19_v0 = vld [vmem:[%s214_s1 + $0x18] sm:$0xff]  ;;  %129 = vmatprep.subr.mxu0 %v169_v1  ;;  %v18_v2 = vld [vmem:[%s214_s1 + $0x10] sm:$0xff]  ;;  %137 = vmatprep.mubr.msk.f32.mxu0 %vm170_vm0, %v169_v1 }
   0x2   :  { %130 = vmatpush3.msra.mxu0 %v19_v0 }
   0x3   :  { %8 = vsyncpa [#allocation3], 0  ;;  %131 = vmatprep.subr.mxu0 %v169_v1  ;;  %v17_v3 = vld [vmem:[%s214_s1 + $0x8] sm:$0xff]  ;;  %v16_v4 = vld [vmem:[%s214_s1] sm:$0xff]  ;;  %vm27_vm1 = vcmask 261120   ;;  %s171_s1 = smov [#allocation2]  }
   0x4   :  { %132 = vmatpush3.msra.mxu0 %v18_v2  ;;  %v15_v5 = vld [vmem:[%s213_s0] sm:$0xff]  ;;  %s114_s24 = sshll.u32 %s171_s1, 4  ;;  %vm106_vm2 = vcmask 64512   ;;  %s115_s24 = int_to_ptr.vmem [resolvable:$true] %s114_s24 }
   0x5   :  { %133 = vmatprep.subr.mxu0 %v169_v1  ;;  %v122_v6 = vld [vmem:[%s215_s2] ss:$0 sm:$0xff]  ;;  %s147_s0 = scalar_lea.vmem %s115_s24, 128  ;;  %p152_p1 = scmp.lt.s32.totalorder %s115_s24, %s115_s24 }
   0x6   :  { %134 = vmatpush3.msra.mxu0 %v17_v3  ;;  %p148_p0 = scmp.ne.s32.totalorder %s115_s24, %s147_s0  ;;  %p153_p2 = scmp.lt.s32.totalorder %s147_s0, %s147_s0 }
   0x7   :  { %135 = vmatprep.subr.mxu0 %v169_v1 }
   0x8   :  { %136 = vmatpush3.msra.mxu0 %v16_v4  ;;  %p154_p3 = por %p153_p2, %p152_p1 }
   0x9   :  { %138 = vmatmul.mubr.msk.f32.vlgmr.msra.gmra.mxu0 %vm27_vm1, %v15_v5 }
   0xa   :  { %p155_p4 = pnand %p154_p3, %p148_p0 }
  0xc9   :  { %v97_v7 = vpop.f32.mrf.mxu0 }
  0xca   :  { %v98_v8 = vadd.f32 %v122_v6, %v97_v7 }
  0xcb   :  { %v139_v9 = vpop.f32.mrf.mxu0 }
  0xcc   :  { %v101_v10 = vsub.f32 0.0, %v98_v8 }
  0xce   :  { %v102_v11 = vmul.f32 1.442695, %v101_v10 }
  0xd0   :  { %143 = vpow2.f32 %v102_v11 }
  0xdd   :  { %v144_v12 = vpop.eup %143 }
  0xde   :  { %v104_v13 = vadd.f32 1.0, %v144_v12 }
  0xe0   :  { %145 = vrcp.f32 %v104_v13 }
  0xed   :  { %v146_v14 = vpop.eup %145 }
  0xee   :  { %107 = vst.msk [vmem:[#allocation2] sm:$0xff] %vm106_vm2, %v146_v14 }
  0xef   :  { %158 = shalt.err (!%p155_p4)
}
  0xf0   :  { %117 = dma.vmem_to_hbm [thread:$0]  %s115_s24, 128, %s216_s3, [#allocation3]  }
  0xf1   :  { %167 = dma.done.wait [#allocation3], 128  }
  0xf2   :  { %168 = vsyncadd [#allocation3], 4294967168 }
  0xf3   :  { %121 = vsyncpa [#allocation3], 1 }

// kernel: tpu_custom_call.1
= control target key start
LH: loop header
LB: loop body
LE: loop exit
PB: predicated region body
PF: predicated region fallthrough
CT: control target
= control target key end

     0   :  { %v169_v1 = vmov 0.0   ;;  %vm170_vm0 = vmmov 0   ;;  %s213_s0 = inlined_call_operand.vmem [shape: f32[8,32], index: 0, kind: input, shape index: {}]   ;;  %s214_s1 = inlined_call_operand.vmem [shape: f32[32,8], index: 1, kind: input, shape index: {}]   ;;  %s215_s2 = inlined_call_operand.vmem [shape: f32[1,8], index: 2, kind: input, shape index: {}]   ;;  %s216_s3 = inlined_call_operand.hbm [shape: f32[8,8], index: 3, kind: output, shape index: {}]  }
   0x1   :  { %v19_v0 = vld [vmem:[%s214_s1 + $0x18] sm:$0xff]  ;;  %129 = vmatprep.subr.mxu0 %v169_v1  ;;  %v18_v2 = vld [vmem:[%s214_s1 + $0x10] sm:$0xff]  ;;  %137 = vmatprep.mubr.msk.f32.mxu0 %vm170_vm0, %v169_v1 }
   0x2   :  { %130 = vmatpush3.msra.mxu0 %v19_v0 }
   0x3   :  { %8 = vsyncpa [#allocation3], 0  ;;  %131 = vmatprep.subr.mxu0 %v169_v1  ;;  %v17_v3 = vld [vmem:[%s214_s1 + $0x8] sm:$0xff]  ;;  %v16_v4 = vld [vmem:[%s214_s1] sm:$0xff]  ;;  %vm27_vm1 = vcmask 261120   ;;  %s171_s1 = smov [#allocation2]  }
   0x4   :  { %132 = vmatpush3.msra.mxu0 %v18_v2  ;;  %v15_v5 = vld [vmem:[%s213_s0] sm:$0xff]  ;;  %s114_s24 = sshll.u32 %s171_s1, 4  ;;  %vm106_vm2 = vcmask 64512   ;;  %s115_s24 = int_to_ptr.vmem [resolvable:$true] %s114_s24 }
   0x5   :  { %133 = vmatprep.subr.mxu0 %v169_v1  ;;  %v122_v6 = vld [vmem:[%s215_s2] ss:$0 sm:$0xff]  ;;  %s147_s0 = scalar_lea.vmem %s115_s24, 128  ;;  %p152_p1 = scmp.lt.s32.totalorder %s115_s24, %s115_s24 }
   0x6   :  { %134 = vmatpush3.msra.mxu0 %v17_v3  ;;  %p148_p0 = scmp.ne.s32.totalorder %s115_s24, %s147_s0  ;;  %p153_p2 = scmp.lt.s32.totalorder %s147_s0, %s147_s0 }
   0x7   :  { %135 = vmatprep.subr.mxu0 %v169_v1 }
   0x8   :  { %136 = vmatpush3.msra.mxu0 %v16_v4  ;;  %p154_p3 = por %p153_p2, %p152_p1 }
   0x9   :  { %138 = vmatmul.mubr.msk.f32.vlgmr.msra.gmra.mxu0 %vm27_vm1, %v15_v5 }
   0xa   :  { %p155_p4 = pnand %p154_p3, %p148_p0 }
  0xc9   :  { %v97_v7 = vpop.f32.mrf.mxu0 }
  0xca   :  { %v98_v8 = vadd.f32 %v122_v6, %v97_v7 }
  0xcb   :  { %v139_v9 = vpop.f32.mrf.mxu0 }
  0xcc   :  { %v101_v10 = vsub.f32 0.0, %v98_v8 }
  0xce   :  { %v102_v11 = vmul.f32 1.442695, %v101_v10 }
  0xd0   :  { %143 = vpow2.f32 %v102_v11 }
  0xdd   :  { %v144_v12 = vpop.eup %143 }
  0xde   :  { %v104_v13 = vadd.f32 1.0, %v144_v12 }
  0xe0   :  { %145 = vrcp.f32 %v104_v13 }
  0xed   :  { %v146_v14 = vpop.eup %145 }
  0xee   :  { %107 = vst.msk [vmem:[#allocation2] sm:$0xff] %vm106_vm2, %v146_v14 }
  0xef   :  { %158 = shalt.err (!%p155_p4)
}
  0xf0   :  { %117 = dma.vmem_to_hbm [thread:$0]  %s115_s24, 128, %s216_s3, [#allocation3]  }
  0xf1   :  { %167 = dma.done.wait [#allocation3], 128  }
  0xf2   :  { %168 = vsyncadd [#allocation3], 4294967168 }
  0xf3   :  { %121 = vsyncpa [#allocation3], 1 }

</bundles_post_ra>
